<compile_context>
chip_gen: v6e
topology: v6e:2x2x1
jax: 0.10.0
libtpu: 0.0.40
codegen_flags: <defaults>
</compile_context>

<pallas_src>
import functools

import jax
import jax.numpy as jnp
from jax import lax
from jax.experimental import pallas as pl
from jax.experimental.pallas import tpu as pltpu


# ---------------------------------------------------------------------------
# One-time probe: pin down pltpu.roll's rotation direction so the static tap
# shifts are provably correct under either convention.
# ---------------------------------------------------------------------------
def _roll_probe_kernel(x_ref, o_ref):
    o_ref[...] = pltpu.roll(x_ref[...], 1, 1)


@functools.lru_cache(maxsize=1)
def _roll_is_forward():
    """True iff pltpu.roll follows np.roll semantics: out[i] == in[(i - shift) % n]."""
    x = lax.broadcasted_iota(jnp.float32, (8, 128), 1)
    out = pl.pallas_call(
        _roll_probe_kernel,
        out_shape=jax.ShapeDtypeStruct((8, 128), jnp.float32),
    )(x)
    return bool(jax.device_get(out[0, 0]) == 127.0)


# ---------------------------------------------------------------------------
# Kernel: one batch element per grid step, fully lane-dense channel-planar.
# ---------------------------------------------------------------------------
def _encoder_kernel(x_ref, w1_ref, b1_ref, w2_ref, b2_ref, mask_ref,
                    conv_ref, pool_ref, *, wp, lpad, roll_forward):
    """Refs (per grid step):

    x_ref   : (1, Cin, Lpad)  flattened zero-padded input frame (NCHW-flat)
    w1_ref  : (9, Cm, Cin)    per-tap conv1 weights, BN1 scale folded in
    b1_ref  : (Cm, 1)         folded BN1 bias
    w2_ref  : (9, Cm, Cm)     per-tap conv2 weights, BN2 scale folded in
    b2_ref  : (Cm, 1)         folded BN2 bias
    mask_ref: (1, Lpad)       1.0 on frame interior, 0.0 on 1-px halo / tail
    conv_ref: (1, Cm, Lpad)   DoubleConv output frame (interior is valid)
    pool_ref: (1, Cm, Lpad)   rolling 2x2-max frame (wrapper subsamples)
    """

    def shift_for(delta):
        # Static lane-roll amount such that rolled[q] == frame[q + delta].
        return (-delta) % lpad if roll_forward else delta % lpad

    def conv3x3(frame, w_ref):
        # frame: (C_in, Lpad); w_ref: (9, C_out, C_in)  ->  (C_out, Lpad)
        acc = None
        for kh in range(3):
            for kw in range(3):
                d = (kh - 1) * wp + (kw - 1)           # flat spatial offset
                tap = frame if d == 0 else pltpu.roll(frame, shift_for(d), 1)
                part = jnp.dot(w_ref[kh * 3 + kw], tap,
                               preferred_element_type=jnp.float32)
                acc = part if acc is None else acc + part
        return acc

    x = x_ref[0]                      # (Cin, Lpad)
    mask = mask_ref[...]              # (1, Lpad)

    # conv1 (BN1 scale pre-folded) + bias + ReLU; re-zero the padded halo so
    # the second conv sees exact zero padding.
    h1 = conv3x3(x, w1_ref)
    h1 = jnp.maximum(h1 + b1_ref[...], 0.0) * mask

    # conv2 (BN2 scale pre-folded) + bias + ReLU.
    h2 = conv3x3(h1, w2_ref)
    h2 = jnp.maximum(h2 + b2_ref[...], 0.0)
    conv_ref[0] = h2                  # lane-dense unmasked store

    # 2x2 max pool (stride 2): rolling max over right / down neighbours; the
    # interior stride-2 subsample is a free XLA slice in the wrapper.
    hmax = jnp.maximum(h2, pltpu.roll(h2, shift_for(1), 1))
    vmax = jnp.maximum(hmax, pltpu.roll(hmax, shift_for(wp), 1))
    pool_ref[0] = vmax                # lane-dense unmasked store


# ---------------------------------------------------------------------------
# Wrapper
# ---------------------------------------------------------------------------
@functools.partial(jax.jit, static_argnames=("roll_forward",))
def _encoder_forward_impl(x_nchw, w1, s1, b1, w2, s2, b2, *, roll_forward):
    N, Cin, H, W = x_nchw.shape
    Cm = w1.shape[-1]                     # mid_channels == out_channels
    Hp, Wp = H + 2, W + 2
    L = Hp * Wp
    Lpad = ((L + 127) // 128) * 128       # lane-dense frame length

    # Flatten the zero-padded frame onto the lane axis (no NHWC transpose).
    xp = jnp.pad(x_nchw, ((0, 0), (0, 0), (1, 1), (1, 1)))
    xf = jnp.pad(xp.reshape(N, Cin, L), ((0, 0), (0, 0), (0, Lpad - L)))

    # Fold BN scales into the conv weights; reorder HWIO -> (9, Cout, Cin).
    w1k = jnp.transpose((w1 * s1).reshape(9, Cin, Cm), (0, 2, 1))
    w2k = jnp.transpose((w2 * s2).reshape(9, Cm, Cm), (0, 2, 1))
    b1k = b1.reshape(Cm, 1)
    b2k = b2.reshape(Cm, 1)

    # Interior mask (zero on the 1-px halo and on the lane-pad tail).
    q = jnp.arange(L)
    r, c = q // Wp, q % Wp
    interior = (r >= 1) & (r <= Hp - 2) & (c >= 1) & (c <= Wp - 2)
    mask = jnp.pad(interior.astype(jnp.float32), (0, Lpad - L)).reshape(1, Lpad)

    kernel = functools.partial(_encoder_kernel, wp=Wp, lpad=Lpad,
                               roll_forward=roll_forward)

    flops = 2 * N * H * W * (9 * Cin * Cm + 9 * Cm * Cm)
    bytes_accessed = 4 * (N * Cin * Lpad + 9 * Cm * (Cin + Cm) + 2 * Cm
                          + Lpad + 2 * N * Cm * Lpad)

    conv_f, pool_f = pl.pallas_call(
        kernel,
        out_shape=(jax.ShapeDtypeStruct((N, Cm, Lpad), jnp.float32),
                   jax.ShapeDtypeStruct((N, Cm, Lpad), jnp.float32)),
        grid_spec=pltpu.PrefetchScalarGridSpec(
            num_scalar_prefetch=0,
            grid=(N,),
            in_specs=[
                pl.BlockSpec((1, Cin, Lpad), lambda n: (n, 0, 0)),
                pl.BlockSpec((9, Cm, Cin), lambda n: (0, 0, 0)),
                pl.BlockSpec((Cm, 1), lambda n: (0, 0)),
                pl.BlockSpec((9, Cm, Cm), lambda n: (0, 0, 0)),
                pl.BlockSpec((Cm, 1), lambda n: (0, 0)),
                pl.BlockSpec((1, Lpad), lambda n: (0, 0)),
            ],
            out_specs=[
                pl.BlockSpec((1, Cm, Lpad), lambda n: (n, 0, 0)),
                pl.BlockSpec((1, Cm, Lpad), lambda n: (n, 0, 0)),
            ],
        ),
        compiler_params=pltpu.CompilerParams(
            dimension_semantics=("parallel",)),
        cost_estimate=pl.CostEstimate(flops=int(flops), transcendentals=0,
                                      bytes_accessed=int(bytes_accessed)),
    )(xf, w1k, b1k, w2k, b2k, mask)

    # Lane-dense frames -> PyTorch NCHW outputs (cheap XLA slices, no transpose).
    conv = conv_f[:, :, :L].reshape(N, Cm, Hp, Wp)[:, :, 1:Hp - 1, 1:Wp - 1]
    pool = pool_f[:, :, :L].reshape(N, Cm, Hp, Wp)[:, :, 1:Hp - 1:2, 1:Wp - 1:2]
    return conv, pool


def encoder_forward(x_nchw, w1, s1, b1, w2, s2, b2):
    """Encoder forward.

    x_nchw : (N, Cin, H, W) f32
    w1     : (3, 3, Cin, Cout) HWIO conv1 weights;  s1/b1: folded BN1 scale/bias (Cout,)
    w2     : (3, 3, Cout, Cout) HWIO conv2 weights; s2/b2: folded BN2 scale/bias (Cout,)
    returns (conv, pool): (N, Cout, H, W), (N, Cout, H//2, W//2)
    """
    return _encoder_forward_impl(x_nchw, w1, s1, b1, w2, s2, b2,
                                 roll_forward=_roll_is_forward())


# ---------------------------------------------------------------------------
# BN folding + pure-JAX reference
# ---------------------------------------------------------------------------
def _fold_bn(gamma, beta, mean, var, eps=1e-5):
    scale = gamma / jnp.sqrt(var + eps)
    return scale, beta - mean * scale


def _reference_forward(x_nchw, w1, s1, b1, w2, s2, b2):
    N, _, H, W = x_nchw.shape
    Cm = w1.shape[-1]
    xt = jnp.transpose(x_nchw, (0, 2, 3, 1))
    dn = lax.conv_dimension_numbers(xt.shape, w1.shape, ("NHWC", "HWIO", "NHWC"))
    y = lax.conv_general_dilated(xt, w1, (1, 1), "SAME", dimension_numbers=dn)
    y = jnp.maximum(y * s1 + b1, 0.0)
    dn2 = lax.conv_dimension_numbers(y.shape, w2.shape, ("NHWC", "HWIO", "NHWC"))
    y = lax.conv_general_dilated(y, w2, (1, 1), "SAME", dimension_numbers=dn2)
    y = jnp.maximum(y * s2 + b2, 0.0)
    conv = jnp.transpose(y, (0, 3, 1, 2))
    pool = jnp.max(conv.reshape(N, Cm, H // 2, 2, W // 2, 2), axis=(3, 5))
    return conv, pool


if __name__ == "__main__":
    # Encoder(in_channels=4, out_channels=8) on (2, 4, 16, 16) input.
    N, Cin, Cout, H, W = 2, 4, 8, 16, 16

    key = jax.random.PRNGKey(0)
    keys = jax.random.split(key, 11)

    x = jax.random.normal(keys[0], (N, Cin, H, W), jnp.float32)
    w1 = 0.1 * jax.random.normal(keys[1], (3, 3, Cin, Cout), jnp.float32)
    w2 = 0.1 * jax.random.normal(keys[2], (3, 3, Cout, Cout), jnp.float32)

    g1 = 1.0 + 0.1 * jax.random.normal(keys[3], (Cout,), jnp.float32)
    be1 = 0.1 * jax.random.normal(keys[4], (Cout,), jnp.float32)
    m1 = 0.1 * jax.random.normal(keys[5], (Cout,), jnp.float32)
    v1 = 0.5 + jax.random.uniform(keys[6], (Cout,), jnp.float32)
    g2 = 1.0 + 0.1 * jax.random.normal(keys[7], (Cout,), jnp.float32)
    be2 = 0.1 * jax.random.normal(keys[8], (Cout,), jnp.float32)
    m2 = 0.1 * jax.random.normal(keys[9], (Cout,), jnp.float32)
    v2 = 0.5 + jax.random.uniform(keys[10], (Cout,), jnp.float32)

    s1, b1 = _fold_bn(g1, be1, m1, v1)
    s2, b2 = _fold_bn(g2, be2, m2, v2)

    conv, pool = encoder_forward(x, w1, s1, b1, w2, s2, b2)
    conv, pool = jax.block_until_ready((conv, pool))

    conv_ref, pool_ref = jax.block_until_ready(
        _reference_forward(x, w1, s1, b1, w2, s2, b2))

    assert conv.shape == (N, Cout, H, W), conv.shape
    assert pool.shape == (N, Cout, H // 2, W // 2), pool.shape
    assert jnp.allclose(conv, conv_ref, atol=1e-4, rtol=1e-4), (
        float(jnp.max(jnp.abs(conv - conv_ref))))
    assert jnp.allclose(pool, pool_ref, atol=1e-4, rtol=1e-4), (
        float(jnp.max(jnp.abs(pool - pool_ref))))

    print("KERNEL_OK")
</pallas_src>

<mosaic_0001>
module attributes {stable_mosaic.version = 11 : i64} {
  func.func @_roll_probe_kernel(%arg0: memref<8x128xf32, #tpu.memory_space<vmem>>, %arg1: memref<8x128xf32, #tpu.memory_space<vmem>>) attributes {dimension_semantics = [], scalar_prefetch = 0 : i64, scratch_operands = 0 : i64, tpu.core_type = #tpu.core_type<tc>} {
    %c0 = arith.constant 0 : index
    %c0_0 = arith.constant 0 : index
    %0 = vector.load %arg0[%c0, %c0_0] : memref<8x128xf32, #tpu.memory_space<vmem>>, vector<8x128xf32>
    %c1_i32 = arith.constant 1 : i32
    %1 = tpu.dynamic_rotate %0 by %c1_i32 dim 1 : vector<8x128xf32>, i32 -> vector<8x128xf32>
    %c0_1 = arith.constant 0 : index
    %c0_2 = arith.constant 0 : index
    %2 = vector.load %arg1[%c0_1, %c0_2] : memref<8x128xf32, #tpu.memory_space<vmem>>, vector<8x128xf32>
    tpu.vector_store %arg1[%c0_1, %c0_2], %1 {strides = array<i32>} : memref<8x128xf32, #tpu.memory_space<vmem>>, vector<8x128xf32>,
    return
  }
}

</mosaic_0001>

<bundles_post_ra>
// kernel: tpu_custom_call.1
= control target key start
LH: loop header
LB: loop body
LE: loop exit
PB: predicated region body
PF: predicated region fallthrough
CT: control target
= control target key end

     0   :  { %6 = vsyncpa [#allocation3], 0  ;;  %s106_s0 = inlined_call_operand.hbm [shape: f32[8,128], index: 0, kind: input, shape index: {}]   ;;  %s107_s1 = inlined_call_operand.hbm [shape: f32[8,128], index: 1, kind: output, shape index: {}]  }
   0x1   :  { %7 = vsyncpa [#allocation4], 0  ;;  %s87_s6 = smov [#allocation2]  }
   0x2   :  { %s14_s7 = sshll.u32 %s87_s6, 4  ;;  %s15_s7 = int_to_ptr.vmem [resolvable:$true] %s14_s7 }
   0x3   :  { %s51_s8 = scalar_lea.vmem %s15_s7, 128  ;;  %p56_p1 = scmp.lt.s32.totalorder %s15_s7, %s15_s7 }
   0x4   :  { %p52_p0 = scmp.ne.s32.totalorder %s15_s7, %s51_s8  ;;  %p57_p2 = scmp.lt.s32.totalorder %s51_s8, %s51_s8 }
   0x6   :  { %p58_p3 = por %p57_p2, %p56_p1 }
   0x8   :  { %p59_p4 = pnand %p58_p3, %p52_p0 }
   0xa   :  { %62 = shalt.err (!%p59_p4)
}
   0xb   :  { %17 = dma.hbm_to_vmem [thread:$0]  %s106_s0, 128, %s15_s7, [#allocation3]  }
   0xc   :  { %83 = dma.done.wait [#allocation3], 128  }
   0xd   :  { %84 = vsyncadd [#allocation3], 4294967168  ;;  %v21_v0 = vld [vmem:[#allocation2] sm:$0xff]  ;;  %s88_s11 = smov 1   ;;  %s89_s12 = smov [#allocation5]  }
   0xe   :  { %22 = vrot.lane.b32.xlu0 %v21_v0, %s88_s11  ;;  %s31_s13 = sshll.u32 %s89_s12, 4  ;;  %s32_s13 = int_to_ptr.vmem [resolvable:$true] %s31_s13 }
   0xf   :  { %s63_s14 = scalar_lea.vmem %s32_s13, 128  ;;  %p68_p6 = scmp.lt.s32.totalorder %s32_s13, %s32_s13 }
  0x10   :  { %p64_p5 = scmp.ne.s32.totalorder %s32_s13, %s63_s14  ;;  %p69_p7 = scmp.lt.s32.totalorder %s63_s14, %s63_s14 }
  0x12   :  { %p70_p8 = por %p69_p7, %p68_p6 }
  0x14   :  { %p71_p9 = pnand %p70_p8, %p64_p5 }
  0x80   :  { %v23_v1 = vpop.permute.xlu0 %22 }
  0x81   :  { %24 = vst [vmem:[#allocation5] sm:$0xff] %v23_v1 }
  0x82   :  { %74 = shalt.err (!%p71_p9)
}
  0x83   :  { %34 = dma.vmem_to_hbm [thread:$0]  %s32_s13, 128, %s107_s1, [#allocation4]  }
  0x84   :  { %85 = dma.done.wait [#allocation4], 128  }
  0x85   :  { %86 = vsyncadd [#allocation4], 4294967168 }
  0x86   :  { %38 = vsyncpa [#allocation3], 1 }
  0x87   :  { %39 = vsyncpa [#allocation4], 1 }

</bundles_post_ra>
